<compile_context>
chip_gen: v7x
topology: tpu7x:2x2x1
jax: 0.10.0
libtpu: 0.0.40
codegen_flags: <defaults>
</compile_context>

<pallas_src>
import math

import jax
import jax.numpy as jnp
from jax.experimental import pallas as pl
from jax.experimental.pallas import tpu as pltpu

EPS = 1e-12  # matches torch.nn.functional.normalize default eps

VMEM_TILE_BUDGET = 40 * 1024 * 1024   # target working set (fits v7x's 64 MiB VMEM)
VMEM_LIMIT_CAP = 48 * 1024 * 1024     # never request more scoped VMEM than this


def _round_up(a, b):
    return (a + b - 1) // b * b


def _itemsize(dtype):
    return jnp.dtype(dtype).itemsize


def _sublane(dtype):
    # sublane packing: f32 -> 8, bf16 -> 16, int8/fp8 -> 32
    return {4: 8, 2: 16, 1: 32}.get(_itemsize(dtype), 8)


# ---------------------------------------------------------------------------
# Kernels
# ---------------------------------------------------------------------------
def _cosine_kernel_plain(x_ref, sx_ref, w_ref, o_ref):
    # x_ref : (TM, Dp) native dtype
    # sx_ref: (TM, 1)  f32 = sigma / max(||x||, eps)   (precomputed in wrapper)
    # w_ref : (TN, Dp) pre-normalized weight rows      (precomputed in wrapper)
    raw = jax.lax.dot_general(
        x_ref[...], w_ref[...],
        dimension_numbers=(((1,), (1,)), ((), ())),   # contract shared D axis
        preferred_element_type=jnp.float32)           # (TM, TN) f32 on the MXU
    o_ref[...] = (raw * sx_ref[...]).astype(o_ref.dtype)


def _cosine_kernel_reduce(x_ref, ix_ref, w_ref, sigma_ref, o_ref,
                          m_sc, d_sc, a_sc):
    # Grid = (batch tiles, class tiles, nb_proxy); proxy axis innermost
    # ("arbitrary").  Online softmax over proxies with VMEM scratch accumulators.
    p = pl.program_id(2)

    @pl.when(p == 0)
    def _():
        m_sc[...] = jnp.full_like(m_sc, -jnp.inf)
        d_sc[...] = jnp.zeros_like(d_sc)
        a_sc[...] = jnp.zeros_like(a_sc)

    raw = jax.lax.dot_general(
        x_ref[...], w_ref[0],                         # w_ref block is (1, TC, Dp)
        dimension_numbers=(((1,), (1,)), ((), ())),
        preferred_element_type=jnp.float32)           # (TM, TC)
    s = raw * ix_ref[...]                             # cosine similarity (no sigma)

    m_new = jnp.maximum(m_sc[...], s)
    alpha = jnp.exp(m_sc[...] - m_new)
    e = jnp.exp(s - m_new)
    d_sc[...] = alpha * d_sc[...] + e
    a_sc[...] = alpha * a_sc[...] + e * s
    m_sc[...] = m_new

    @pl.when(p == pl.num_programs(2) - 1)
    def _():
        red = a_sc[...] * pl.reciprocal(d_sc[...], approx=True)   # EUP vrcp
        o_ref[...] = (sigma_ref[0] * red).astype(o_ref.dtype)


# ---------------------------------------------------------------------------
# Weight preparation (per-weight, cacheable across forward calls)
# ---------------------------------------------------------------------------
def prepare_cosine_linear2(weight, sigma, *, nb_proxy=1, to_reduce=False,
                           tile_n=256):
    """Normalize (and, for the reduce path, reorder) the weight once.

    Returns a dict of prepared arrays + metadata; pass it to
    `cosine_linear2_apply`.  Cache this across forward calls.
    """
    OF, D = weight.shape
    Dp = _round_up(D, 128)
    do_reduce = bool(to_reduce and nb_proxy > 1)
    sigma_val = (jnp.float32(1.0) if sigma is None
                 else jnp.asarray(sigma, jnp.float32).reshape(()))

    # F.normalize(weight, dim=1): w / max(||w||, eps).  Zero rows stay zero.
    wf = weight.astype(jnp.float32)
    inv_wn = jax.lax.rsqrt(
        jnp.maximum(jnp.sum(wf * wf, axis=1, keepdims=True), EPS * EPS))
    wn = (wf * inv_wn).astype(weight.dtype)
    if Dp != D:
        wn = jnp.pad(wn, ((0, 0), (0, Dp - D)))       # zero-pad D (no effect on dot)

    w_bytes = _itemsize(weight.dtype)

    def _shrink_tile(t):
        # keep a double-buffered weight stream modest (<= 16 MiB)
        while t > 128 and 2 * t * Dp * w_bytes > (16 << 20):
            t = max(128, _round_up(t // 2, 128))
        return t

    if do_reduce:
        assert OF % nb_proxy == 0, "Shape error"
        n_cls = OF // nb_proxy
        tc = _shrink_tile(min(tile_n, _round_up(n_cls, 128)))
        c_pad = _round_up(n_cls, tc)
        # weight row r == (class r // nb_proxy, proxy r % nb_proxy)
        w3 = wn.reshape(n_cls, nb_proxy, Dp)
        if c_pad != n_cls:
            w3 = jnp.pad(w3, ((0, c_pad - n_cls), (0, 0), (0, 0)))
        w_prep = jnp.transpose(w3, (1, 0, 2))          # (nb_proxy, c_pad, Dp)
        return dict(do_reduce=True, nb_proxy=nb_proxy, sigma=sigma_val,
                    w=w_prep, D=D, Dp=Dp, tn=tc,
                    out_cols=n_cls, out_cols_pad=c_pad)
    else:
        tn = _shrink_tile(min(tile_n, _round_up(OF, 128)))
        of_pad = _round_up(OF, tn)
        if of_pad != OF:
            wn = jnp.pad(wn, ((0, of_pad - OF), (0, 0)))
        return dict(do_reduce=False, nb_proxy=nb_proxy, sigma=sigma_val,
                    w=wn, D=D, Dp=Dp, tn=tn,
                    out_cols=OF, out_cols_pad=of_pad)


# ---------------------------------------------------------------------------
# Forward (apply prepared params)
# ---------------------------------------------------------------------------
def cosine_linear2_apply(params, x, *, tile_m=256):
    B, D = x.shape
    assert D == params["D"], "in_features mismatch"
    Dp = params["Dp"]
    tn = params["tn"]
    w = params["w"]
    do_reduce = params["do_reduce"]
    sigma = params["sigma"]
    out_cols_pad = params["out_cols_pad"]

    sub = _sublane(x.dtype)
    tm = max(sub, min(_round_up(tile_m, sub), _round_up(B, sub)))

    in_b = _itemsize(x.dtype)
    w_b = _itemsize(w.dtype)
    out_b = _itemsize(x.dtype)

    def _est(tm_):
        e = 2 * (tm_ * Dp * in_b + tn * Dp * w_b)      # double-buffered inputs
        e += 2 * tm_ * 4                               # (tm,1) f32 scale stream
        e += 2 * tm_ * tn * out_b                      # double-buffered output
        if do_reduce:
            e += 3 * tm_ * tn * 4                      # online-softmax scratch
        return e

    while _est(tm) > VMEM_TILE_BUDGET and tm > sub:
        tm = max(sub, _round_up(tm // 2, sub))

    b_pad = _round_up(B, tm)
    n_tiles = out_cols_pad // tn

    # v7x megacore: make sure at least one "parallel" axis has >= 2 tiles.
    if b_pad // tm == 1 and n_tiles == 1 and tm >= 2 * sub and B > sub:
        tm = _round_up((tm + 1) // 2, sub)
        b_pad = _round_up(B, tm)

    if b_pad != B or Dp != D:
        x_p = jnp.pad(x, ((0, b_pad - B), (0, Dp - D)))
    else:
        x_p = x

    # Hoisted per-row x norm (F.normalize eps semantics); padded rows are
    # harmless: their raw dot is exactly 0 and they are sliced off below.
    xf = x_p.astype(jnp.float32)
    inv_x = jax.lax.rsqrt(
        jnp.maximum(jnp.sum(xf * xf, axis=1, keepdims=True), EPS * EPS))  # (b_pad,1)

    vmem_limit = int(min(max(_est(tm) + (8 << 20), 32 << 20), VMEM_LIMIT_CAP))
    out_shape = jax.ShapeDtypeStruct((b_pad, out_cols_pad), x.dtype)

    if do_reduce:
        nb_proxy = params["nb_proxy"]
        scale_x = inv_x                                # sigma applied after the reduce
        sigma_arr = sigma.reshape((1,))
        grid = (b_pad // tm, n_tiles, nb_proxy)
        grid_spec = pltpu.PrefetchScalarGridSpec(
            num_scalar_prefetch=0,
            grid=grid,
            in_specs=[
                pl.BlockSpec((tm, Dp), lambda i, j, p: (i, 0)),        # x tile
                pl.BlockSpec((tm, 1), lambda i, j, p: (i, 0)),         # 1/||x||
                pl.BlockSpec((1, tn, Dp), lambda i, j, p: (p, j, 0)),  # per-proxy weight tile
                pl.BlockSpec(memory_space=pltpu.MemorySpace.SMEM),     # sigma scalar
            ],
            out_specs=pl.BlockSpec((tm, tn), lambda i, j, p: (i, j)),
            scratch_shapes=[pltpu.VMEM((tm, tn), jnp.float32)] * 3,    # m, denom, acc
        )
        out = pl.pallas_call(
            _cosine_kernel_reduce,
            out_shape=out_shape,
            grid_spec=grid_spec,
            compiler_params=pltpu.CompilerParams(
                dimension_semantics=("parallel", "parallel", "arbitrary"),
                vmem_limit_bytes=vmem_limit,
            ),
        )(x_p, scale_x, w, sigma_arr)
    else:
        scale_x = sigma * inv_x                        # fold sigma into the x scale
        grid = (b_pad // tm, n_tiles)
        grid_spec = pltpu.PrefetchScalarGridSpec(
            num_scalar_prefetch=0,
            grid=grid,
            in_specs=[
                pl.BlockSpec((tm, Dp), lambda i, j: (i, 0)),           # x tile
                pl.BlockSpec((tm, 1), lambda i, j: (i, 0)),            # sigma/||x||
                pl.BlockSpec((tn, Dp), lambda i, j: (j, 0)),           # normalized weight tile
            ],
            out_specs=pl.BlockSpec((tm, tn), lambda i, j: (i, j)),
        )
        out = pl.pallas_call(
            _cosine_kernel_plain,
            out_shape=out_shape,
            grid_spec=grid_spec,
            compiler_params=pltpu.CompilerParams(
                dimension_semantics=("parallel", "parallel"),
                vmem_limit_bytes=vmem_limit,
            ),
        )(x_p, scale_x, w)

    return {"train_logits": out[:B, :params["out_cols"]]}


def cosine_linear2_forward(x, weight, sigma, *, nb_proxy=1, to_reduce=False,
                           tile_m=256, tile_n=256):
    """Convenience one-shot wrapper (prepares the weight every call; cache
    `prepare_cosine_linear2` output + use `cosine_linear2_apply` in steady state)."""
    params = prepare_cosine_linear2(weight, sigma, nb_proxy=nb_proxy,
                                    to_reduce=to_reduce, tile_n=tile_n)
    return cosine_linear2_apply(params, x, tile_m=tile_m)


# ---------------------------------------------------------------------------
# Pure-JAX reference (mirrors the PyTorch module)
# ---------------------------------------------------------------------------
def _reference_forward(x, weight, sigma, *, nb_proxy=1, to_reduce=False):
    xn = x / jnp.maximum(jnp.linalg.norm(x, axis=1, keepdims=True), EPS)
    wn = weight / jnp.maximum(jnp.linalg.norm(weight, axis=1, keepdims=True), EPS)
    out = xn @ wn.T
    if to_reduce and nb_proxy > 1:
        bs = out.shape[0]
        n_cls = out.shape[1] // nb_proxy
        simi = out.reshape(bs, n_cls, nb_proxy)
        att = jax.nn.softmax(simi, axis=-1)
        out = (att * simi).sum(-1)
    if sigma is not None:
        out = sigma * out
    return out


if __name__ == "__main__":
    key = jax.random.PRNGKey(0)
    kx, kw = jax.random.split(key)

    batch = 8
    in_features = 32
    out_features = 16
    nb_proxy = 2

    # reset_parameters(): weight ~ U(-stdv, stdv), stdv = 1/sqrt(in_features); sigma = 1
    stdv = 1.0 / math.sqrt(in_features)
    weight = jax.random.uniform(
        kw, (out_features * nb_proxy, in_features),
        minval=-stdv, maxval=stdv, dtype=jnp.float32,
    )
    sigma = jnp.float32(1.0)
    x = jax.random.normal(kx, (batch, in_features), dtype=jnp.float32)

    ok = True

    # plain path (no proxy reduction)
    params_plain = prepare_cosine_linear2(weight, sigma, nb_proxy=nb_proxy,
                                          to_reduce=False)
    out = cosine_linear2_apply(params_plain, x)["train_logits"]
    jax.block_until_ready(out)
    ref = _reference_forward(x, weight, sigma, nb_proxy=nb_proxy, to_reduce=False)
    ok &= bool(jnp.allclose(out, ref, atol=1e-5, rtol=1e-5))

    # proxy-softmax reduce path (approx EUP reciprocal -> slightly looser tol)
    params_red = prepare_cosine_linear2(weight, sigma, nb_proxy=nb_proxy,
                                        to_reduce=True)
    out = cosine_linear2_apply(params_red, x)["train_logits"]
    jax.block_until_ready(out)
    ref = _reference_forward(x, weight, sigma, nb_proxy=nb_proxy, to_reduce=True)
    ok &= bool(jnp.allclose(out, ref, atol=1e-3, rtol=1e-3))

    # sigma=None path via the convenience wrapper
    out = cosine_linear2_forward(x, weight, None, nb_proxy=nb_proxy,
                                 to_reduce=True)["train_logits"]
    jax.block_until_ready(out)
    ref = _reference_forward(x, weight, None, nb_proxy=nb_proxy, to_reduce=True)
    ok &= bool(jnp.allclose(out, ref, atol=1e-3, rtol=1e-3))

    print("KERNEL_OK" if ok else "KERNEL_MISMATCH")
</pallas_src>

<mosaic_0001>
module attributes {stable_mosaic.version = 11 : i64} {
  func.func @_cosine_kernel_plain(%arg0: i32, %arg1: i32, %arg2: memref<8x128xf32, #tpu.memory_space<vmem>>, %arg3: memref<8x1xf32, #tpu.memory_space<vmem>>, %arg4: memref<128x128xf32, #tpu.memory_space<vmem>>, %arg5: memref<8x128xf32, #tpu.memory_space<vmem>>) attributes {dimension_semantics = [#tpu.dimension_semantics<parallel>, #tpu.dimension_semantics<parallel>], iteration_bounds = array<i64: 1, 1>, scalar_prefetch = 0 : i64, scratch_operands = 0 : i64, tpu.core_type = #tpu.core_type<tc>, window_params = [{transform_indices = @transform_0, window_bounds = array<i64: 8, 128>}, {transform_indices = @transform_1, window_bounds = array<i64: 8, 1>}, {transform_indices = @transform_2, window_bounds = array<i64: 128, 128>}, {transform_indices = @transform_3, window_bounds = array<i64: 8, 128>}]} {
    %c0 = arith.constant 0 : index
    %c0_0 = arith.constant 0 : index
    %0 = vector.load %arg2[%c0, %c0_0] : memref<8x128xf32, #tpu.memory_space<vmem>>, vector<8x128xf32>
    %c0_1 = arith.constant 0 : index
    %c0_2 = arith.constant 0 : index
    %1 = vector.load %arg4[%c0_1, %c0_2] : memref<128x128xf32, #tpu.memory_space<vmem>>, vector<128x128xf32>
    %cst = arith.constant dense<0.000000e+00> : vector<8x128xf32>
    %2 = tpu.matmul %0, %1, %cst {dimension_numbers = #tpu.dot_dimension_numbers<[1], [1], [0], [0], [0, 0, 1, 0], [], []>} : vector<8x128xf32>, vector<128x128xf32>, vector<8x128xf32> -> vector<8x128xf32>
    %c0_3 = arith.constant 0 : index
    %c0_4 = arith.constant 0 : index
    %3 = vector.load %arg3[%c0_3, %c0_4] : memref<8x1xf32, #tpu.memory_space<vmem>>, vector<8x1xf32>
    %4 = vector.broadcast %3 : vector<8x1xf32> to vector<8x128xf32>
    %5 = arith.mulf %2, %4 : vector<8x128xf32>
    %c0_5 = arith.constant 0 : index
    %c0_6 = arith.constant 0 : index
    %6 = vector.load %arg5[%c0_5, %c0_6] : memref<8x128xf32, #tpu.memory_space<vmem>>, vector<8x128xf32>
    tpu.vector_store %arg5[%c0_5, %c0_6], %5 {strides = array<i32>} : memref<8x128xf32, #tpu.memory_space<vmem>>, vector<8x128xf32>,
    return
  }
  func.func @transform_0(%arg0: i32, %arg1: i32) -> (i32, i32) {
    %c0_i32 = arith.constant 0 : i32
    %c0_i32_0 = arith.constant 0 : i32
    return %arg0, %c0_i32 : i32, i32
  }
  func.func @transform_1(%arg0: i32, %arg1: i32) -> (i32, i32) {
    %c0_i32 = arith.constant 0 : i32
    %c0_i32_0 = arith.constant 0 : i32
    return %arg0, %c0_i32 : i32, i32
  }
  func.func @transform_2(%arg0: i32, %arg1: i32) -> (i32, i32) {
    %c0_i32 = arith.constant 0 : i32
    %c0_i32_0 = arith.constant 0 : i32
    return %arg1, %c0_i32 : i32, i32
  }
  func.func @transform_3(%arg0: i32, %arg1: i32) -> (i32, i32) {
    %c0_i32 = arith.constant 0 : i32
    return %arg0, %arg1 : i32, i32
  }
}

</mosaic_0001>

<bundles_post_ra>
// kernel: tpu_custom_call.1
= control target key start
LH: loop header
LB: loop body
LE: loop exit
PB: predicated region body
PF: predicated region fallthrough
CT: control target
= control target key end

     0   :  { %8 = vsyncpa [#allocation3], 0  ;;  %s330_s0 = inlined_call_operand.vmem [shape: f32[8,128], index: 0, kind: input, shape index: {}]   ;;  %s331_s1 = inlined_call_operand.vmem [shape: f32[8,1], index: 1, kind: input, shape index: {}]   ;;  %s332_s2 = inlined_call_operand.hbm [shape: f32[128,128], index: 2, kind: input, shape index: {}]   ;;  %s333_s3 = inlined_call_operand.hbm [shape: f32[8,128], index: 3, kind: output, shape index: {}]  }
   0x1   :  { %9 = vsyncpa [#allocation4], 0  ;;  %s272_s12 = smov [#allocation2]   ;;  %s224_s16 = scalar_lea.hbm %s332_s2, 2048 }
   0x2   :  { %s19_s13 = sshll.u32 %s272_s12, 4  ;;  %p225_p0 = scmp.ne.s32.totalorder %s332_s2, %s224_s16  ;;  %s20_s13 = int_to_ptr.vmem [resolvable:$true] %s19_s13 }
   0x3   :  { %p228_p1 = scmp.lt.u32.totalorder %s224_s16, %s332_s2 }
   0x5   :  { %p230_p2 = pnand %p228_p1, %p225_p0 }
   0x7   :  { %233 = shalt.err (!%p230_p2)
}
   0x8   :  { %s234_s21 = scalar_lea.vmem %s20_s13, 2048  ;;  %p239_p4 = scmp.lt.s32.totalorder %s20_s13, %s20_s13 }
   0x9   :  { %p235_p3 = scmp.ne.s32.totalorder %s20_s13, %s234_s21  ;;  %p240_p5 = scmp.lt.s32.totalorder %s234_s21, %s234_s21 }
   0xb   :  { %p241_p6 = por %p240_p5, %p239_p4 }
   0xd   :  { %p242_p7 = pnand %p241_p6, %p235_p3 }
   0xf   :  { %245 = shalt.err (!%p242_p7)
}
  0x10   :  { %s273_s22 = smov 128   ;;  %s274_s23 = smov 8  }
  0x11   :  { %25 = dma.hbm_to_vmem [thread:$0]  %s332_s2, 2048, %s20_s13, [#allocation3], %s273_s22, %s273_s22, %s274_s23  }
  0x12   :  { %268 = dma.done.wait [#allocation3], 2048  }
  0x13   :  { %269 = vsyncadd [#allocation3], 4294965248  ;;  %v275_v0 = vmov 0.0|0.0   ;;  %vm276_vm0 = vmmov 0   ;;  %v277_v1 = vmov 0.0   ;;  %v278_v2 = vmov 0  }
  0x14   :  { %191 = vmatprep.subr.bf16.mxu0 %v275_v0  ;;  %188 = vmatprep.mubr.msk.f32.mxu0 %vm276_vm0, %v277_v1  ;;  %v30_v3 = vld [vmem:[#allocation2] sm:$0xff]  ;;  %v31_v4 = vld [vmem:[#allocation2 + $0x8] sm:$0xff]  ;;  %v32_v6 = vld [vmem:[#allocation2 + $0x10] sm:$0xff]  ;;  %s279_s28 = smov [#allocation5]  }
  0x15   :  { %223 = vset.pattern.permute.xlu0 %v278_v2  ;;  %v192_v5 = vpack.c.bf16 %v31_v4, %v30_v3  ;;  %v33_v7 = vld [vmem:[#allocation2 + $0x18] sm:$0xff]  ;;  %v116_v8 = vld [vmem:[%s331_s1] sm:$0xff]  ;;  %v35_v11 = vld [vmem:[#allocation2 + $0x28] sm:$0xff]  ;;  %s130_s29 = sshll.u32 %s279_s28, 4  ;;  %s131_s29 = int_to_ptr.vmem [resolvable:$true] %s130_s29 }
  0x16   :  { %119 = vperm.xlu0 %223, %v116_v8   ;;  %v195_v9 = vpack.c.bf16 %v33_v7, %v32_v6  ;;  %v34_v10 = vld [vmem:[#allocation2 + $0x20] sm:$0xff]  ;;  %v36_v13 = vld [vmem:[#allocation2 + $0x30] sm:$0xff]  ;;  %v37_v14 = vld [vmem:[#allocation2 + $0x38] sm:$0xff]  ;;  %s246_s30 = scalar_lea.vmem %s131_s29, 128  ;;  %p251_p9 = scmp.lt.s32.totalorder %s131_s29, %s131_s29 }
  0x17   :  { %193 = vmatpush3.bf16.xpose.msra.mxu0 %v192_v5  ;;  %v198_v12 = vpack.c.bf16 %v35_v11, %v34_v10  ;;  %v201_v15 = vpack.c.bf16 %v37_v14, %v36_v13  ;;  %v38_v16 = vld [vmem:[#allocation2 + $0x40] sm:$0xff]  ;;  %v39_v17 = vld [vmem:[#allocation2 + $0x48] sm:$0xff]  ;;  %v40_v19 = vld [vmem:[#allocation2 + $0x50] sm:$0xff]  ;;  %p247_p8 = scmp.ne.s32.totalorder %s131_s29, %s246_s30  ;;  %p252_p10 = scmp.lt.s32.totalorder %s246_s30, %s246_s30 }
  0x18   :  { %194 = vmatprep.subr.bf16.mxu0 %v275_v0  ;;  %v204_v18 = vpack.c.bf16 %v39_v17, %v38_v16  ;;  %v41_v20 = vld [vmem:[#allocation2 + $0x58] sm:$0xff]  ;;  %v42_v22 = vld [vmem:[#allocation2 + $0x60] sm:$0xff]  ;;  %v43_v23 = vld [vmem:[#allocation2 + $0x68] sm:$0xff] }
  0x19   :  { %v207_v21 = vpack.c.bf16 %v41_v20, %v40_v19  ;;  %v210_v24 = vpack.c.bf16 %v43_v23, %v42_v22  ;;  %v44_v25 = vld [vmem:[#allocation2 + $0x70] sm:$0xff]  ;;  %v45_v26 = vld [vmem:[#allocation2 + $0x78] sm:$0xff]  ;;  %v29_v28 = vld [vmem:[%s330_s0] sm:$0xff]  ;;  %p253_p11 = por %p252_p10, %p251_p9 }
  0x1a   :  { %v213_v27 = vpack.c.bf16 %v45_v26, %v44_v25 }
  0x1b   :  { %p254_p12 = pnand %p253_p11, %p247_p8 }
  0x1f   :  { %196 = vmatpush3.bf16.xpose.msra.mxu0 %v195_v9 }
  0x20   :  { %197 = vmatprep.subr.bf16.mxu0 %v275_v0 }
  0x27   :  { %199 = vmatpush3.bf16.xpose.msra.mxu0 %v198_v12 }
  0x28   :  { %200 = vmatprep.subr.bf16.mxu0 %v275_v0 }
  0x2f   :  { %202 = vmatpush3.bf16.xpose.msra.mxu0 %v201_v15 }
  0x30   :  { %203 = vmatprep.subr.bf16.mxu0 %v275_v0 }
  0x37   :  { %205 = vmatpush3.bf16.xpose.msra.mxu0 %v204_v18 }
  0x38   :  { %206 = vmatprep.subr.bf16.mxu0 %v275_v0 }
  0x3f   :  { %208 = vmatpush3.bf16.xpose.msra.mxu0 %v207_v21 }
  0x40   :  { %209 = vmatprep.subr.bf16.mxu0 %v275_v0 }
  0x47   :  { %211 = vmatpush3.bf16.xpose.msra.mxu0 %v210_v24 }
  0x48   :  { %212 = vmatprep.subr.bf16.mxu0 %v275_v0 }
  0x4f   :  { %214 = vmatpush3.bf16.xpose.msra.mxu0 %v213_v27 }
  0x56   :  { %189 = vmatmul.mubr.f32.vlgmr.msra.gmra.mrb[0].mxu0 %v29_v28 }
  0x95   :  { %v120_v29 = vpop.permute.xlu0 %119 }
 0x129   :  { %v112_v30 = vpop.f32.mrb[0].mxu0 }
 0x12a   :  { %v122_v31 = vmul.f32 %v120_v29, %v112_v30  ;;  %v190_v32 = vpop.f32.mrb[1].mxu0 }
 0x12c   :  { %123 = vst [vmem:[#allocation5] sm:$0xff] %v122_v31 }
 0x12d   :  { %257 = shalt.err (!%p254_p12)
}
 0x12e   :  { %s258_s0 = scalar_lea.hbm %s333_s3, 128 }
 0x12f   :  { %p259_p13 = scmp.ne.s32.totalorder %s333_s3, %s258_s0  ;;  %p262_p0 = scmp.lt.u32.totalorder %s258_s0, %s333_s3 }
 0x131   :  { %p264_p1 = pnand %p262_p0, %p259_p13 }
 0x133   :  { %267 = shalt.err (!%p264_p1)
}
 0x134   :  { %133 = dma.vmem_to_hbm [thread:$0]  %s131_s29, 128, %s333_s3, [#allocation4]  }
 0x135   :  { %270 = dma.done.wait [#allocation4], 128  }
 0x136   :  { %271 = vsyncadd [#allocation4], 4294967168 }
 0x137   :  { %137 = vsyncpa [#allocation3], 1 }
 0x138   :  { %138 = vsyncpa [#allocation4], 1 }

</bundles_post_ra>
